<compile_context>
chip_gen: v7x
topology: tpu7x:2x2x1
jax: 0.10.0
libtpu: 0.0.40
codegen_flags: <defaults>
</compile_context>

<pallas_src>
import jax
import jax.numpy as jnp
from jax.experimental import pallas as pl
from jax.experimental.pallas import tpu as pltpu


def _round_up(n, m):
    return ((n + m - 1) // m) * m


def rbf_kernel(x_ref, ct_ref, x2_ref, par_ref, o_ref, acc_ref):
    k = pl.program_id(2)

    @pl.when(k == 0)
    def _():
        acc_ref[...] = jnp.zeros_like(acc_ref)

    # Cross term on the MXU.  centers_t was pre-scaled by 2 in the wrapper,
    # so acc accumulates 2 * x . c (f32) over the K chunks.
    acc_ref[...] += jnp.dot(x_ref[...], ct_ref[...],
                            preferred_element_type=jnp.float32)

    @pl.when(k == pl.num_programs(2) - 1)
    def _():
        par = par_ref[...]                      # (2, tc) f32
        c2 = par[0:1, :]                        # ||c||^2
        inv = par[1:2, :]                       # 1 / (2 * sigma^2)
        # ||x - c||^2 = ||x||^2 + ||c||^2 - 2 x.c, clamped at 0 against
        # catastrophic cancellation in the expanded form.
        dist = jnp.maximum(x2_ref[...] + c2 - acc_ref[...], 0.0)
        # out = exp(-dist / (2 sigma^2)); VPU mul + EUP exp, cast in-kernel.
        o_ref[...] = jnp.exp(-dist * inv).astype(o_ref.dtype)


def rbf_layer(x, centers, log_sigmas, *, tb=512, tc=256, tk_max=1024,
              force_f32_matmul=False):
    """x: (B, D); centers: (C, D); log_sigmas: (C,) -> (B, C) in x.dtype."""
    B, D = x.shape
    C, _ = centers.shape
    out_dtype = x.dtype
    mm_dtype = jnp.float32 if force_f32_matmul else x.dtype

    x32 = x.astype(jnp.float32)
    c32 = centers.astype(jnp.float32)
    ls32 = log_sigmas.astype(jnp.float32)

    # Hoisted per-row / per-center terms (kept in f32 for the epilogue).
    x2 = jnp.sum(x32 * x32, axis=-1, keepdims=True)          # (B, 1)
    c2 = jnp.sum(c32 * c32, axis=-1)                         # (C,)
    inv_two_sig_sq = 0.5 * jnp.exp(-2.0 * ls32)              # 1/(2*sigma^2)

    # MXU operands: factor 2 folded into the pre-transposed centers.
    x_mm = x.astype(mm_dtype)                                # (B, D)
    centers_t = (2.0 * c32).T.astype(mm_dtype)               # (D, C)

    # Tile sizes: sublane-aligned B tile, lane-dense C tile, K chunked only
    # when D is large enough to threaten the double-buffered VMEM budget.
    tb = max(8, min(tb, _round_up(B, 8)))
    tc = max(128, min(tc, _round_up(C, 128)))
    tk_max = max(128, _round_up(tk_max, 128))
    if D <= tk_max:
        tk, Kp = D, D
    else:
        tk = tk_max
        Kp = _round_up(D, tk)
    Bp = _round_up(B, tb)
    Cp = _round_up(C, tc)

    # Zero-padding: padded K contributes nothing to the dot product; padded
    # B rows / C columns are sliced off below.
    if (Bp, Kp) != (B, D):
        x_mm = jnp.pad(x_mm, ((0, Bp - B), (0, Kp - D)))
    if Bp != B:
        x2 = jnp.pad(x2, ((0, Bp - B), (0, 0)))
    if (Kp, Cp) != (D, C):
        centers_t = jnp.pad(centers_t, ((0, Kp - D), (0, Cp - C)))
    if Cp != C:
        c2 = jnp.pad(c2, (0, Cp - C))
        inv_two_sig_sq = jnp.pad(inv_two_sig_sq, (0, Cp - C))
    params = jnp.stack([c2, inv_two_sig_sq], axis=0)          # (2, Cp) f32

    grid = (Bp // tb, Cp // tc, Kp // tk)

    # VMEM budget: double-buffered operand/output tiles + f32 accumulator,
    # with 2x headroom, capped at 48 MiB (safe on v7x's 64 MiB per TC).
    mm_b = jnp.dtype(mm_dtype).itemsize
    out_b = jnp.dtype(out_dtype).itemsize
    tile_bytes = (2 * (tb * tk * mm_b + tk * tc * mm_b
                       + tb * tc * out_b + (tb + 2 * tc) * 4)
                  + tb * tc * 4)
    vmem_limit = int(min(48 * 1024 * 1024,
                         max(16 * 1024 * 1024, 2 * tile_bytes)))

    out = pl.pallas_call(
        rbf_kernel,
        out_shape=jax.ShapeDtypeStruct((Bp, Cp), out_dtype),
        grid=grid,
        in_specs=[
            pl.BlockSpec((tb, tk), lambda i, j, k: (i, k)),   # x tile
            pl.BlockSpec((tk, tc), lambda i, j, k: (k, j)),   # (2*centers)^T tile
            pl.BlockSpec((tb, 1), lambda i, j, k: (i, 0)),    # ||x||^2 tile
            pl.BlockSpec((2, tc), lambda i, j, k: (0, j)),    # [||c||^2; 1/(2s^2)]
        ],
        out_specs=pl.BlockSpec((tb, tc), lambda i, j, k: (i, j)),
        scratch_shapes=[pltpu.VMEM((tb, tc), jnp.float32)],
        compiler_params=pltpu.CompilerParams(
            dimension_semantics=("parallel", "parallel", "arbitrary"),
            vmem_limit_bytes=vmem_limit,
        ),
    )(x_mm, centers_t, x2, params)

    return out[:B, :C]


def rbf_reference(x, centers, log_sigmas):
    """Pure-JAX reference mirroring the PyTorch broadcast/reduce semantics."""
    diff = x[:, None, :] - centers[None, :, :]         # (B, C, D)
    dist = jnp.sum(diff * diff, axis=-1)               # (B, C)
    sig = jnp.exp(log_sigmas)                          # (C,)
    return jnp.exp(-dist / (2.0 * sig * sig))


if __name__ == "__main__":
    # Small shapes consistent with the module: batch=8, input_dim=32, centers=16
    B, D, C = 8, 32, 16

    key = jax.random.PRNGKey(0)
    kx, kc = jax.random.split(key)

    x = jax.random.normal(kx, (B, D), dtype=jnp.float32)
    # Deterministic parameter init matching __init__: centers ~ randn, log_sigmas = 0
    centers = jax.random.normal(kc, (C, D), dtype=jnp.float32)
    log_sigmas = jnp.zeros((C,), dtype=jnp.float32)

    out = rbf_layer(x, centers, log_sigmas)
    out = jax.block_until_ready(out)

    ref = rbf_reference(x, centers, log_sigmas)
    assert out.shape == (B, C)
    assert out.dtype == x.dtype
    assert jnp.allclose(out, ref, atol=1e-5, rtol=1e-5), "mismatch vs reference"

    print("KERNEL_OK")
</pallas_src>

<mosaic_0001>
module attributes {stable_mosaic.version = 11 : i64} {
  func.func @rbf_kernel(%arg0: i32, %arg1: i32, %arg2: i32, %arg3: memref<8x32xf32, #tpu.memory_space<vmem>>, %arg4: memref<32x128xf32, #tpu.memory_space<vmem>>, %arg5: memref<8x1xf32, #tpu.memory_space<vmem>>, %arg6: memref<2x128xf32, #tpu.memory_space<vmem>>, %arg7: memref<8x128xf32, #tpu.memory_space<vmem>>, %arg8: memref<8x128xf32, #tpu.memory_space<vmem>>) attributes {dimension_semantics = [#tpu.dimension_semantics<parallel>, #tpu.dimension_semantics<parallel>, #tpu.dimension_semantics<arbitrary>], iteration_bounds = array<i64: 1, 1, 1>, scalar_prefetch = 0 : i64, scratch_operands = 1 : i64, tpu.core_type = #tpu.core_type<tc>, window_params = [{transform_indices = @transform_0, window_bounds = array<i64: 8, 32>}, {transform_indices = @transform_1, window_bounds = array<i64: 32, 128>}, {transform_indices = @transform_2, window_bounds = array<i64: 8, 1>}, {transform_indices = @transform_3, window_bounds = array<i64: 2, 128>}, {transform_indices = @transform_4, window_bounds = array<i64: 8, 128>}]} {
    %c0_i32 = arith.constant 0 : i32
    %0 = arith.cmpi eq, %arg2, %c0_i32 : i32
    %1 = arith.extui %0 : i1 to i32
    %c0_i32_0 = arith.constant 0 : i32
    %2 = arith.cmpi ne, %1, %c0_i32_0 : i32
    scf.if %2 {
      %cst_10 = arith.constant 0.000000e+00 : f32
      %12 = vector.broadcast %cst_10 : f32 to vector<8x128xf32>
      %c0_11 = arith.constant 0 : index
      %c0_12 = arith.constant 0 : index
      %13 = vector.load %arg8[%c0_11, %c0_12] : memref<8x128xf32, #tpu.memory_space<vmem>>, vector<8x128xf32>
      tpu.vector_store %arg8[%c0_11, %c0_12], %12 {strides = array<i32>} : memref<8x128xf32, #tpu.memory_space<vmem>>, vector<8x128xf32>,
    } else {
    }
    %c0 = arith.constant 0 : index
    %c0_1 = arith.constant 0 : index
    %3 = vector.load %arg8[%c0, %c0_1] : memref<8x128xf32, #tpu.memory_space<vmem>>, vector<8x128xf32>
    %c0_2 = arith.constant 0 : index
    %c0_3 = arith.constant 0 : index
    %4 = vector.load %arg3[%c0_2, %c0_3] : memref<8x32xf32, #tpu.memory_space<vmem>>, vector<8x32xf32>
    %c0_4 = arith.constant 0 : index
    %c0_5 = arith.constant 0 : index
    %5 = vector.load %arg4[%c0_4, %c0_5] : memref<32x128xf32, #tpu.memory_space<vmem>>, vector<32x128xf32>
    %cst = arith.constant dense<0.000000e+00> : vector<8x128xf32>
    %6 = tpu.matmul %4, %5, %cst {dimension_numbers = #tpu.dot_dimension_numbers<[1], [0], [0], [1], [0, 0, 1, 1], [], []>} : vector<8x32xf32>, vector<32x128xf32>, vector<8x128xf32> -> vector<8x128xf32>
    %7 = arith.addf %3, %6 : vector<8x128xf32>
    %c0_6 = arith.constant 0 : index
    %c0_7 = arith.constant 0 : index
    %8 = vector.load %arg8[%c0_6, %c0_7] : memref<8x128xf32, #tpu.memory_space<vmem>>, vector<8x128xf32>
    tpu.vector_store %arg8[%c0_6, %c0_7], %7 {strides = array<i32>} : memref<8x128xf32, #tpu.memory_space<vmem>>, vector<8x128xf32>,
    %c0_i32_8 = arith.constant 0 : i32
    %9 = arith.cmpi eq, %arg2, %c0_i32_8 : i32
    %10 = arith.extui %9 : i1 to i32
    %c0_i32_9 = arith.constant 0 : i32
    %11 = arith.cmpi ne, %10, %c0_i32_9 : i32
    scf.if %11 {
      %c0_10 = arith.constant 0 : index
      %c0_11 = arith.constant 0 : index
      %12 = vector.load %arg6[%c0_10, %c0_11] : memref<2x128xf32, #tpu.memory_space<vmem>>, vector<2x128xf32>
      %13 = vector.extract_strided_slice %12 {offsets = [0, 0], sizes = [1, 128], strides = [1, 1]} : vector<2x128xf32> to vector<1x128xf32>
      %14 = vector.extract_strided_slice %12 {offsets = [1, 0], sizes = [1, 128], strides = [1, 1]} : vector<2x128xf32> to vector<1x128xf32>
      %c0_12 = arith.constant 0 : index
      %c0_13 = arith.constant 0 : index
      %15 = vector.load %arg5[%c0_12, %c0_13] : memref<8x1xf32, #tpu.memory_space<vmem>>, vector<8x1xf32>
      %16 = vector.broadcast %15 : vector<8x1xf32> to vector<8x128xf32>
      %17 = vector.broadcast %13 : vector<1x128xf32> to vector<8x128xf32>
      %18 = arith.addf %16, %17 : vector<8x128xf32>
      %c0_14 = arith.constant 0 : index
      %c0_15 = arith.constant 0 : index
      %19 = vector.load %arg8[%c0_14, %c0_15] : memref<8x128xf32, #tpu.memory_space<vmem>>, vector<8x128xf32>
      %20 = arith.subf %18, %19 : vector<8x128xf32>
      %cst_16 = arith.constant 0.000000e+00 : f32
      %21 = vector.broadcast %cst_16 : f32 to vector<8x128xf32>
      %22 = arith.maximumf %20, %21 : vector<8x128xf32>
      %cst_17 = arith.constant 0.000000e+00 : f32
      %23 = vector.broadcast %cst_17 : f32 to vector<8x128xf32>
      %24 = arith.subf %23, %22 : vector<8x128xf32>
      %25 = vector.broadcast %14 : vector<1x128xf32> to vector<8x128xf32>
      %26 = arith.mulf %24, %25 : vector<8x128xf32>
      %27 = math.exp %26 : vector<8x128xf32>
      %c0_18 = arith.constant 0 : index
      %c0_19 = arith.constant 0 : index
      %28 = vector.load %arg7[%c0_18, %c0_19] : memref<8x128xf32, #tpu.memory_space<vmem>>, vector<8x128xf32>
      tpu.vector_store %arg7[%c0_18, %c0_19], %27 {strides = array<i32>} : memref<8x128xf32, #tpu.memory_space<vmem>>, vector<8x128xf32>,
    } else {
    }
    return
  }
  func.func @transform_0(%arg0: i32, %arg1: i32, %arg2: i32) -> (i32, i32) {
    %c0_i32 = arith.constant 0 : i32
    return %arg0, %arg2 : i32, i32
  }
  func.func @transform_1(%arg0: i32, %arg1: i32, %arg2: i32) -> (i32, i32) {
    %c0_i32 = arith.constant 0 : i32
    return %arg2, %arg1 : i32, i32
  }
  func.func @transform_2(%arg0: i32, %arg1: i32, %arg2: i32) -> (i32, i32) {
    %c0_i32 = arith.constant 0 : i32
    %c0_i32_0 = arith.constant 0 : i32
    return %arg0, %c0_i32 : i32, i32
  }
  func.func @transform_3(%arg0: i32, %arg1: i32, %arg2: i32) -> (i32, i32) {
    %c0_i32 = arith.constant 0 : i32
    %c0_i32_0 = arith.constant 0 : i32
    return %c0_i32, %arg1 : i32, i32
  }
  func.func @transform_4(%arg0: i32, %arg1: i32, %arg2: i32) -> (i32, i32) {
    %c0_i32 = arith.constant 0 : i32
    return %arg0, %arg1 : i32, i32
  }
}

</mosaic_0001>

<bundles_post_ra>
// kernel: tpu_custom_call.1
= control target key start
LH: loop header
LB: loop body
LE: loop exit
PB: predicated region body
PF: predicated region fallthrough
CT: control target
= control target key end

     0   :  { %9 = vsyncpa [#allocation4], 0  ;;  %s309_s0 = inlined_call_operand.vmem [shape: f32[8,32], index: 0, kind: input, shape index: {}]   ;;  %s310_s1 = inlined_call_operand.hbm [shape: f32[32,128], index: 1, kind: input, shape index: {}]   ;;  %s311_s2 = inlined_call_operand.vmem [shape: f32[8,1], index: 2, kind: input, shape index: {}]   ;;  %s312_s3 = inlined_call_operand.vmem [shape: f32[2,128], index: 3, kind: input, shape index: {}]   ;;  %s313_s4 = inlined_call_operand.hbm [shape: f32[8,128], index: 4, kind: output, shape index: {}]  }
   0x1   :  { %10 = vsyncpa [#allocation5], 0  ;;  %s243_s15 = smov [#allocation3]   ;;  %s195_s19 = scalar_lea.hbm %s310_s1, 512 }
   0x2   :  { %s18_s16 = sshll.u32 %s243_s15, 4  ;;  %p196_p0 = scmp.ne.s32.totalorder %s310_s1, %s195_s19  ;;  %s19_s16 = int_to_ptr.vmem [resolvable:$true] %s18_s16 }
   0x3   :  { %p199_p1 = scmp.lt.u32.totalorder %s195_s19, %s310_s1 }
   0x5   :  { %p201_p2 = pnand %p199_p1, %p196_p0 }
   0x7   :  { %204 = shalt.err (!%p201_p2)
}
   0x8   :  { %s205_s24 = scalar_lea.vmem %s19_s16, 512  ;;  %p210_p4 = scmp.lt.s32.totalorder %s19_s16, %s19_s16 }
   0x9   :  { %p206_p3 = scmp.ne.s32.totalorder %s19_s16, %s205_s24  ;;  %p211_p5 = scmp.lt.s32.totalorder %s205_s24, %s205_s24 }
   0xb   :  { %p212_p6 = por %p211_p5, %p210_p4 }
   0xd   :  { %p213_p7 = pnand %p212_p6, %p206_p3 }
   0xf   :  { %216 = shalt.err (!%p213_p7)
}
  0x10   :  { %s244_s25 = smov 128   ;;  %s245_s26 = smov 8  }
  0x11   :  { %24 = dma.hbm_to_vmem [thread:$0]  %s310_s1, 512, %s19_s16, [#allocation4], %s244_s25, %s244_s25, %s245_s26  }
  0x12   :  { %239 = dma.done.wait [#allocation4], 512  }
  0x13   :  { %240 = vsyncadd [#allocation4], 4294966784  ;;  %v246_v0 = vmov 0.0|0.0   ;;  %vm247_vm0 = vmmov 0   ;;  %v248_v1 = vmov 0.0   ;;  %v249_v2 = vmov 0  }
  0x14   :  { %178 = vmatprep.subr.bf16.mxu0 %v246_v0  ;;  %175 = vmatprep.mubr.msk.f32.mxu0 %vm247_vm0, %v248_v1  ;;  %v39_v3 = vld [vmem:[#allocation3] sm:$0xff]  ;;  %v40_v4 = vld [vmem:[#allocation3 + $0x8] sm:$0xff]  ;;  %v41_v5 = vld [vmem:[#allocation3 + $0x10] sm:$0xff]  ;;  %vm43_vm1 = vcmask 261120   ;;  %v129_v11 = vlaneseq }
  0x15   :  { %192 = vset.pattern.permute.xlu0 %v249_v2  ;;  %v179_v6 = vpack.c.bf16 %v40_v4, %v39_v3  ;;  %v42_v7 = vld [vmem:[#allocation3 + $0x18] sm:$0xff]  ;;  %v123_v8 = vld [vmem:[%s311_s2] sm:$0xff] }
  0x16   :  { %126 = vperm.xlu0 %192, %v123_v8   ;;  %v182_v9 = vpack.c.bf16 %v42_v7, %v41_v5  ;;  %v38_v10 = vld [vmem:[%s309_s0] sm:$0xff]  ;;  %v130_v12 = vshrl.u32 %v129_v11, 7  ;;  %s250_s0 = smov [#allocation6]  }
  0x17   :  { %180 = vmatpush3.bf16.msra.mxu0 %v179_v6  ;;  %v122_v14 = vld [vmem:[%s312_s3] sm:$0x3]  ;;  %s152_s2 = sshll.u32 %s250_s0, 4  ;;  %s153_s2 = int_to_ptr.vmem [resolvable:$true] %s152_s2 }
  0x18   :  { %181 = vmatprep.subr.bf16.mxu0 %v246_v0  ;;  %v131_v13 = vsub.s32 0, %v130_v12  ;;  %v140_v18 = vsub.s32 1, %v130_v12  ;;  %s217_s8 = scalar_lea.vmem %s153_s2, 128  ;;  %p222_p9 = scmp.lt.s32.totalorder %s153_s2, %s153_s2 }
  0x19   :  { %p218_p8 = scmp.ne.s32.totalorder %s153_s2, %s217_s8  ;;  %p223_p10 = scmp.lt.s32.totalorder %s217_s8, %s217_s8 }
  0x1a   :  { %v132_v15 = vrot.slane %v122_v14, %v131_v13  ;;  %v141_v22 = vrot.slane %v122_v14, %v140_v18 }
  0x1b   :  { %183 = vmatpush3.bf16.msra.mxu0 %v182_v9  ;;  %p224_p11 = por %p223_p10, %p222_p9 }
  0x1d   :  { %p225_p12 = pnand %p224_p11, %p218_p8 }
  0x1e   :  { %176 = vmatmul.mubr.msk.f32.vlgmr.msra.gmra.mrb[0].mxu0 %vm43_vm1, %v38_v10 }
  0x95   :  { %v127_v16 = vpop.permute.xlu0 %126 }
  0x96   :  { %v133_v17 = vadd.f32 %v132_v15, %v127_v16 }
  0xf1   :  { %v113_v19 = vpop.f32.mrb[0].mxu0 }
  0xf2   :  { %v135_v20 = vsub.f32 %v133_v17, %v113_v19  ;;  %v177_v21 = vpop.f32.mrb[1].mxu0 }
  0xf4   :  { %v136_v23 = vmax.f32 %v135_v20, 0.0 }
  0xf6   :  { %v137_v24 = vsub.f32 0.0, %v136_v23 }
  0xf8   :  { %v142_v25 = vmul.f32 %v141_v22, %v137_v24 }
  0xfa   :  { %v143_v26 = vmul.f32 1.442695, %v142_v25 }
  0xfc   :  { %193 = vpow2.f32 %v143_v26 }
 0x106   :  { %v194_v27 = vpop.eup %193 }
 0x107   :  { %145 = vst [vmem:[#allocation6] sm:$0xff] %v194_v27 }
 0x108   :  { %228 = shalt.err (!%p225_p12)
}
 0x109   :  { %s229_s10 = scalar_lea.hbm %s313_s4, 128 }
 0x10a   :  { %p230_p13 = scmp.ne.s32.totalorder %s313_s4, %s229_s10  ;;  %p233_p0 = scmp.lt.u32.totalorder %s229_s10, %s313_s4 }
 0x10c   :  { %p235_p1 = pnand %p233_p0, %p230_p13 }
 0x10e   :  { %238 = shalt.err (!%p235_p1)
}
 0x10f   :  { %155 = dma.vmem_to_hbm [thread:$0]  %s153_s2, 128, %s313_s4, [#allocation5]  }
 0x110   :  { %241 = dma.done.wait [#allocation5], 128  }
 0x111   :  { %242 = vsyncadd [#allocation5], 4294967168 }
 0x112   :  { %159 = vsyncpa [#allocation4], 1 }
 0x113   :  { %160 = vsyncpa [#allocation5], 1 }

</bundles_post_ra>
